<compile_context>
chip_gen: v7x
topology: tpu7x:2x2x1
jax: 0.10.0
libtpu: 0.0.40
codegen_flags: <defaults>
</compile_context>

<pallas_src>
import jax
import jax.numpy as jnp
from jax.experimental import pallas as pl
from jax.experimental.pallas import tpu as pltpu

NEG_SLOPE = 0.01  # nn.LeakyReLU default
LANE = 128        # vreg lane width
SUBLANE = 8       # f32 sublane count


def _round_up(n, m):
    return ((n + m - 1) // m) * m


def _leaky_relu(x):
    return jnp.where(x >= 0, x, NEG_SLOPE * x)


def mlp_kernel(x_ref, w1_ref, b1_ref, w2_ref, b2_ref, o_ref):
    # hidden = leaky_relu(x @ W1 + b1)   (f32 MXU accumulation, f32 elementwise)
    h = jnp.dot(x_ref[...], w1_ref[...], preferred_element_type=jnp.float32)
    h = _leaky_relu(h + b1_ref[...].astype(jnp.float32))
    # out = leaky_relu(h @ W2 + b2)
    y = jnp.dot(h.astype(w2_ref.dtype), w2_ref[...],
                preferred_element_type=jnp.float32)
    y = _leaky_relu(y + b2_ref[...].astype(jnp.float32))
    o_ref[...] = y.astype(o_ref.dtype)


def _vmem_need_bytes(tb, in_dim, hidden, o_cols, itemsize, weight_bufs):
    x_tiles = 2 * tb * in_dim * itemsize                 # double-buffered x tile
    o_tiles = 2 * tb * o_cols * itemsize                 # double-buffered out tile
    weights = weight_bufs * (in_dim * hidden + hidden
                             + hidden * o_cols + o_cols) * itemsize
    interm = tb * hidden * 4 + tb * o_cols * 4           # f32 intermediates h, y
    return x_tiles + o_tiles + weights + interm


def _tpu_vmem_capacity():
    try:
        return int(pltpu.get_tpu_info().vmem_capacity_bytes)
    except Exception:
        return 64 << 20  # conservative (v7x-sized) fallback


def _build_mlp_call(B, in_dim, hidden, o_cols, tb, dtype, vmem_limit, cost,
                    single_buffer_weights):
    weight_kw = {}
    if single_buffer_weights:
        # Constant index_map => never re-fetched; one VMEM buffer is enough.
        weight_kw = dict(pipeline_mode=pl.Buffered(1))

    def wspec(shape):
        return pl.BlockSpec(shape, lambda i: (0, 0), **weight_kw)

    return pl.pallas_call(
        mlp_kernel,
        out_shape=jax.ShapeDtypeStruct((B, o_cols), dtype),
        grid=(pl.cdiv(B, tb),),
        in_specs=[
            pl.BlockSpec((tb, in_dim), lambda i: (i, 0)),  # x: tiled over batch
            wspec((in_dim, hidden)),                       # W1 (VMEM-resident)
            wspec((1, hidden)),                            # b1
            wspec((hidden, o_cols)),                       # W2
            wspec((1, o_cols)),                            # b2
        ],
        out_specs=pl.BlockSpec((tb, o_cols), lambda i: (i, 0)),
        compiler_params=pltpu.CompilerParams(
            dimension_semantics=("parallel",),
            vmem_limit_bytes=vmem_limit,
        ),
        cost_estimate=cost,
    )


def mlp_forward(x, w1, b1, w2, b2, *, tile_b=None):
    """x: [B, input_size]; w1: [input_size, hidden]; b1: [1, hidden];
    w2: [hidden, output]; b2: [1, output]  -> [B, output]"""
    B, in_dim = x.shape
    hidden = w1.shape[1]
    out_dim = w2.shape[1]
    itemsize = jnp.dtype(x.dtype).itemsize

    # --- Generation-aware VMEM budget & default batch tile. ---
    vmem_cap = _tpu_vmem_capacity()
    if vmem_cap >= (100 << 20):        # v5e / v6e: 128 MiB VMEM per core
        vmem_budget = 100 << 20
        default_tile_b = 1024
    else:                              # v7x: 64 MiB VMEM per core
        vmem_budget = 56 << 20
        default_tile_b = 512
    if tile_b is None:
        tile_b = default_tile_b

    # --- Output columns: unpadded for narrow outputs (block last dim == array dim
    #     is legal); lane-pad only wide, non-128-multiple outputs. ---
    if out_dim % LANE != 0 and out_dim >= 64:
        o_cols = _round_up(out_dim, LANE)
        w2c = jnp.pad(w2, ((0, 0), (0, o_cols - out_dim)))
        b2c = jnp.pad(b2, ((0, 0), (0, o_cols - out_dim)))
    else:
        o_cols = out_dim
        w2c, b2c = w2, b2

    # --- Batch tiling without padding x: tb (multiple of 8) nearly divides B,
    #     grid kept >= 2 steps when B allows it (dual-TC v7x; neutral elsewhere). ---
    n_steps = max(pl.cdiv(B, tile_b), 2)
    n_steps = min(n_steps, pl.cdiv(B, SUBLANE))
    tb = _round_up(pl.cdiv(B, n_steps), SUBLANE)

    # Shrink tb (never clamp the limit below the real need) if over budget.
    while tb > SUBLANE and _vmem_need_bytes(tb, in_dim, hidden, o_cols,
                                            itemsize, 2) > vmem_budget:
        tb = _round_up(tb // 2, SUBLANE)
    # TODO(synk): if input_size*hidden alone exceeds the VMEM budget, a K-reduction
    # grid axis with a VMEM accumulator is needed; not required at factorVAE sizes.

    need = _vmem_need_bytes(tb, in_dim, hidden, o_cols, itemsize, 2)
    vmem_limit = int(min(vmem_budget,
                         max(need + max(need // 2, 4 << 20), 16 << 20)))

    flops = 2 * B * (in_dim * hidden + hidden * out_dim)
    bytes_accessed = (B * in_dim + B * o_cols
                      + in_dim * hidden + hidden
                      + hidden * o_cols + o_cols) * itemsize
    cost = pl.CostEstimate(flops=flops, transcendentals=0,
                           bytes_accessed=bytes_accessed)

    args = (x, w1, b1, w2c, b2c)
    try:
        out = _build_mlp_call(B, in_dim, hidden, o_cols, tb, x.dtype,
                              vmem_limit, cost, True)(*args)
        out = jax.block_until_ready(out)
    except Exception:
        # Fallback if this jax/libtpu build rejects pipeline_mode=pl.Buffered(1).
        out = _build_mlp_call(B, in_dim, hidden, o_cols, tb, x.dtype,
                              vmem_limit, cost, False)(*args)

    return out[:, :out_dim] if o_cols != out_dim else out


def init_mlp_params(key, input_size, output_size, hidden_size=32,
                    dtype=jnp.float32):
    """PyTorch nn.Linear-style init: U(-1/sqrt(fan_in), 1/sqrt(fan_in))."""
    k1, k2, k3, k4 = jax.random.split(key, 4)
    bound1 = 1.0 / (input_size ** 0.5)
    bound2 = 1.0 / (hidden_size ** 0.5)
    w1 = jax.random.uniform(k1, (input_size, hidden_size), dtype,
                            minval=-bound1, maxval=bound1)
    b1 = jax.random.uniform(k2, (1, hidden_size), dtype,
                            minval=-bound1, maxval=bound1)
    w2 = jax.random.uniform(k3, (hidden_size, output_size), dtype,
                            minval=-bound2, maxval=bound2)
    b2 = jax.random.uniform(k4, (1, output_size), dtype,
                            minval=-bound2, maxval=bound2)
    return w1, b1, w2, b2


if __name__ == "__main__":
    key = jax.random.PRNGKey(0)
    kx, kp = jax.random.split(key)

    batch, input_size, hidden_size, output_size = 8, 16, 32, 8
    x = jax.random.normal(kx, (batch, input_size), jnp.float32)
    w1, b1, w2, b2 = init_mlp_params(kp, input_size, output_size, hidden_size)

    out = mlp_forward(x, w1, b1, w2, b2)
    out = jax.block_until_ready(out)

    # Pure-JAX reference check of the same forward pass.
    h_ref = x @ w1 + b1
    h_ref = jnp.where(h_ref >= 0, h_ref, NEG_SLOPE * h_ref)
    y_ref = h_ref @ w2 + b2
    y_ref = jnp.where(y_ref >= 0, y_ref, NEG_SLOPE * y_ref)
    assert out.shape == (batch, output_size)
    assert jnp.allclose(out, y_ref, atol=1e-5, rtol=1e-5)

    print("KERNEL_OK")
</pallas_src>

<mosaic_0001>
module attributes {stable_mosaic.version = 11 : i64} {
  func.func @mlp_kernel(%arg0: i32, %arg1: memref<8x16xf32, #tpu.memory_space<vmem>>, %arg2: memref<16x32xf32, #tpu.memory_space<vmem>>, %arg3: memref<1x32xf32, #tpu.memory_space<vmem>>, %arg4: memref<32x8xf32, #tpu.memory_space<vmem>>, %arg5: memref<1x8xf32, #tpu.memory_space<vmem>>, %arg6: memref<8x8xf32, #tpu.memory_space<vmem>>) attributes {dimension_semantics = [#tpu.dimension_semantics<parallel>], iteration_bounds = array<i64: 1>, scalar_prefetch = 0 : i64, scratch_operands = 0 : i64, tpu.core_type = #tpu.core_type<tc>, window_params = [{transform_indices = @transform_0, window_bounds = array<i64: 8, 16>}, {pipeline_mode = #tpu.pipeline_mode<synchronous>, transform_indices = @transform_1, window_bounds = array<i64: 16, 32>}, {pipeline_mode = #tpu.pipeline_mode<synchronous>, transform_indices = @transform_2, window_bounds = array<i64: 1, 32>}, {pipeline_mode = #tpu.pipeline_mode<synchronous>, transform_indices = @transform_3, window_bounds = array<i64: 32, 8>}, {pipeline_mode = #tpu.pipeline_mode<synchronous>, transform_indices = @transform_4, window_bounds = array<i64: 1, 8>}, {transform_indices = @transform_5, window_bounds = array<i64: 8, 8>}]} {
    %c0 = arith.constant 0 : index
    %c0_0 = arith.constant 0 : index
    %0 = vector.load %arg1[%c0, %c0_0] : memref<8x16xf32, #tpu.memory_space<vmem>>, vector<8x16xf32>
    %c0_1 = arith.constant 0 : index
    %c0_2 = arith.constant 0 : index
    %1 = vector.load %arg2[%c0_1, %c0_2] : memref<16x32xf32, #tpu.memory_space<vmem>>, vector<16x32xf32>
    %cst = arith.constant dense<0.000000e+00> : vector<8x32xf32>
    %2 = tpu.matmul %0, %1, %cst {dimension_numbers = #tpu.dot_dimension_numbers<[1], [0], [0], [1], [0, 0, 1, 1], [], []>} : vector<8x16xf32>, vector<16x32xf32>, vector<8x32xf32> -> vector<8x32xf32>
    %c0_3 = arith.constant 0 : index
    %c0_4 = arith.constant 0 : index
    %3 = vector.load %arg3[%c0_3, %c0_4] : memref<1x32xf32, #tpu.memory_space<vmem>>, vector<1x32xf32>
    %4 = vector.broadcast %3 : vector<1x32xf32> to vector<8x32xf32>
    %5 = arith.addf %2, %4 : vector<8x32xf32>
    %cst_5 = arith.constant 0.000000e+00 : f32
    %6 = vector.broadcast %cst_5 : f32 to vector<8x32xf32>
    %7 = arith.cmpf oge, %5, %6 : vector<8x32xf32>
    %cst_6 = arith.constant 0.00999999977 : f32
    %8 = vector.broadcast %cst_6 : f32 to vector<8x32xf32>
    %9 = arith.mulf %8, %5 : vector<8x32xf32>
    %10 = arith.select %7, %5, %9 : vector<8x32xi1>, vector<8x32xf32>
    %c0_7 = arith.constant 0 : index
    %c0_8 = arith.constant 0 : index
    %11 = vector.load %arg4[%c0_7, %c0_8] : memref<32x8xf32, #tpu.memory_space<vmem>>, vector<32x8xf32>
    %cst_9 = arith.constant dense<0.000000e+00> : vector<8x8xf32>
    %12 = tpu.matmul %10, %11, %cst_9 {dimension_numbers = #tpu.dot_dimension_numbers<[1], [0], [0], [1], [0, 0, 1, 1], [], []>} : vector<8x32xf32>, vector<32x8xf32>, vector<8x8xf32> -> vector<8x8xf32>
    %c0_10 = arith.constant 0 : index
    %c0_11 = arith.constant 0 : index
    %13 = vector.load %arg5[%c0_10, %c0_11] : memref<1x8xf32, #tpu.memory_space<vmem>>, vector<1x8xf32>
    %14 = vector.broadcast %13 : vector<1x8xf32> to vector<8x8xf32>
    %15 = arith.addf %12, %14 : vector<8x8xf32>
    %cst_12 = arith.constant 0.000000e+00 : f32
    %16 = vector.broadcast %cst_12 : f32 to vector<8x8xf32>
    %17 = arith.cmpf oge, %15, %16 : vector<8x8xf32>
    %cst_13 = arith.constant 0.00999999977 : f32
    %18 = vector.broadcast %cst_13 : f32 to vector<8x8xf32>
    %19 = arith.mulf %18, %15 : vector<8x8xf32>
    %20 = arith.select %17, %15, %19 : vector<8x8xi1>, vector<8x8xf32>
    %c0_14 = arith.constant 0 : index
    %c0_15 = arith.constant 0 : index
    %21 = vector.load %arg6[%c0_14, %c0_15] : memref<8x8xf32, #tpu.memory_space<vmem>>, vector<8x8xf32>
    tpu.vector_store %arg6[%c0_14, %c0_15], %20 {strides = array<i32>} : memref<8x8xf32, #tpu.memory_space<vmem>>, vector<8x8xf32>,
    return
  }
  func.func @transform_0(%arg0: i32) -> (i32, i32) {
    %c0_i32 = arith.constant 0 : i32
    %c0_i32_0 = arith.constant 0 : i32
    return %arg0, %c0_i32 : i32, i32
  }
  func.func @transform_1(%arg0: i32) -> (i32, i32) {
    %c0_i32 = arith.constant 0 : i32
    %c0_i32_0 = arith.constant 0 : i32
    %c0_i32_1 = arith.constant 0 : i32
    return %c0_i32, %c0_i32_0 : i32, i32
  }
  func.func @transform_2(%arg0: i32) -> (i32, i32) {
    %c0_i32 = arith.constant 0 : i32
    %c0_i32_0 = arith.constant 0 : i32
    %c0_i32_1 = arith.constant 0 : i32
    return %c0_i32, %c0_i32_0 : i32, i32
  }
  func.func @transform_3(%arg0: i32) -> (i32, i32) {
    %c0_i32 = arith.constant 0 : i32
    %c0_i32_0 = arith.constant 0 : i32
    %c0_i32_1 = arith.constant 0 : i32
    return %c0_i32, %c0_i32_0 : i32, i32
  }
  func.func @transform_4(%arg0: i32) -> (i32, i32) {
    %c0_i32 = arith.constant 0 : i32
    %c0_i32_0 = arith.constant 0 : i32
    %c0_i32_1 = arith.constant 0 : i32
    return %c0_i32, %c0_i32_0 : i32, i32
  }
  func.func @transform_5(%arg0: i32) -> (i32, i32) {
    %c0_i32 = arith.constant 0 : i32
    %c0_i32_0 = arith.constant 0 : i32
    return %arg0, %c0_i32 : i32, i32
  }
}

module attributes {stable_mosaic.version = 11 : i64} {
  func.func @mlp_kernel(%arg0: i32, %arg1: memref<8x16xf32, #tpu.memory_space<vmem>>, %arg2: memref<16x32xf32, #tpu.memory_space<vmem>>, %arg3: memref<1x32xf32, #tpu.memory_space<vmem>>, %arg4: memref<32x8xf32, #tpu.memory_space<vmem>>, %arg5: memref<1x8xf32, #tpu.memory_space<vmem>>, %arg6: memref<8x8xf32, #tpu.memory_space<vmem>>) attributes {dimension_semantics = [#tpu.dimension_semantics<parallel>], iteration_bounds = array<i64: 1>, scalar_prefetch = 0 : i64, scratch_operands = 0 : i64, tpu.core_type = #tpu.core_type<tc>, window_params = [{transform_indices = @transform_0, window_bounds = array<i64: 8, 16>}, {pipeline_mode = #tpu.pipeline_mode<synchronous>, transform_indices = @transform_1, window_bounds = array<i64: 16, 32>}, {pipeline_mode = #tpu.pipeline_mode<synchronous>, transform_indices = @transform_2, window_bounds = array<i64: 1, 32>}, {pipeline_mode = #tpu.pipeline_mode<synchronous>, transform_indices = @transform_3, window_bounds = array<i64: 32, 8>}, {pipeline_mode = #tpu.pipeline_mode<synchronous>, transform_indices = @transform_4, window_bounds = array<i64: 1, 8>}, {transform_indices = @transform_5, window_bounds = array<i64: 8, 8>}]} {
    %c0 = arith.constant 0 : index
    %c0_0 = arith.constant 0 : index
    %0 = vector.load %arg1[%c0, %c0_0] : memref<8x16xf32, #tpu.memory_space<vmem>>, vector<8x16xf32>
    %c0_1 = arith.constant 0 : index
    %c0_2 = arith.constant 0 : index
    %1 = vector.load %arg2[%c0_1, %c0_2] : memref<16x32xf32, #tpu.memory_space<vmem>>, vector<16x32xf32>
    %cst = arith.constant dense<0.000000e+00> : vector<8x32xf32>
    %2 = tpu.matmul %0, %1, %cst {dimension_numbers = #tpu.dot_dimension_numbers<[1], [0], [0], [1], [0, 0, 1, 1], [], []>} : vector<8x16xf32>, vector<16x32xf32>, vector<8x32xf32> -> vector<8x32xf32>
    %c0_3 = arith.constant 0 : index
    %c0_4 = arith.constant 0 : index
    %3 = vector.load %arg3[%c0_3, %c0_4] : memref<1x32xf32, #tpu.memory_space<vmem>>, vector<1x32xf32>
    %4 = vector.broadcast %3 : vector<1x32xf32> to vector<8x32xf32>
    %5 = arith.addf %2, %4 : vector<8x32xf32>
    %cst_5 = arith.constant 0.000000e+00 : f32
    %6 = vector.broadcast %cst_5 : f32 to vector<8x32xf32>
    %7 = arith.cmpf oge, %5, %6 : vector<8x32xf32>
    %cst_6 = arith.constant 0.00999999977 : f32
    %8 = vector.broadcast %cst_6 : f32 to vector<8x32xf32>
    %9 = arith.mulf %8, %5 : vector<8x32xf32>
    %10 = arith.select %7, %5, %9 : vector<8x32xi1>, vector<8x32xf32>
    %c0_7 = arith.constant 0 : index
    %c0_8 = arith.constant 0 : index
    %11 = vector.load %arg4[%c0_7, %c0_8] : memref<32x8xf32, #tpu.memory_space<vmem>>, vector<32x8xf32>
    %cst_9 = arith.constant dense<0.000000e+00> : vector<8x8xf32>
    %12 = tpu.matmul %10, %11, %cst_9 {dimension_numbers = #tpu.dot_dimension_numbers<[1], [0], [0], [1], [0, 0, 1, 1], [], []>} : vector<8x32xf32>, vector<32x8xf32>, vector<8x8xf32> -> vector<8x8xf32>
    %c0_10 = arith.constant 0 : index
    %c0_11 = arith.constant 0 : index
    %13 = vector.load %arg5[%c0_10, %c0_11] : memref<1x8xf32, #tpu.memory_space<vmem>>, vector<1x8xf32>
    %14 = vector.broadcast %13 : vector<1x8xf32> to vector<8x8xf32>
    %15 = arith.addf %12, %14 : vector<8x8xf32>
    %cst_12 = arith.constant 0.000000e+00 : f32
    %16 = vector.broadcast %cst_12 : f32 to vector<8x8xf32>
    %17 = arith.cmpf oge, %15, %16 : vector<8x8xf32>
    %cst_13 = arith.constant 0.00999999977 : f32
    %18 = vector.broadcast %cst_13 : f32 to vector<8x8xf32>
    %19 = arith.mulf %18, %15 : vector<8x8xf32>
    %20 = arith.select %17, %15, %19 : vector<8x8xi1>, vector<8x8xf32>
    %c0_14 = arith.constant 0 : index
    %c0_15 = arith.constant 0 : index
    %21 = vector.load %arg6[%c0_14, %c0_15] : memref<8x8xf32, #tpu.memory_space<vmem>>, vector<8x8xf32>
    tpu.vector_store %arg6[%c0_14, %c0_15], %20 {strides = array<i32>} : memref<8x8xf32, #tpu.memory_space<vmem>>, vector<8x8xf32>,
    return
  }
  func.func @transform_0(%arg0: i32) -> (i32, i32) {
    %c0_i32 = arith.constant 0 : i32
    %c0_i32_0 = arith.constant 0 : i32
    return %arg0, %c0_i32 : i32, i32
  }
  func.func @transform_1(%arg0: i32) -> (i32, i32) {
    %c0_i32 = arith.constant 0 : i32
    %c0_i32_0 = arith.constant 0 : i32
    %c0_i32_1 = arith.constant 0 : i32
    return %c0_i32, %c0_i32_0 : i32, i32
  }
  func.func @transform_2(%arg0: i32) -> (i32, i32) {
    %c0_i32 = arith.constant 0 : i32
    %c0_i32_0 = arith.constant 0 : i32
    %c0_i32_1 = arith.constant 0 : i32
    return %c0_i32, %c0_i32_0 : i32, i32
  }
  func.func @transform_3(%arg0: i32) -> (i32, i32) {
    %c0_i32 = arith.constant 0 : i32
    %c0_i32_0 = arith.constant 0 : i32
    %c0_i32_1 = arith.constant 0 : i32
    return %c0_i32, %c0_i32_0 : i32, i32
  }
  func.func @transform_4(%arg0: i32) -> (i32, i32) {
    %c0_i32 = arith.constant 0 : i32
    %c0_i32_0 = arith.constant 0 : i32
    %c0_i32_1 = arith.constant 0 : i32
    return %c0_i32, %c0_i32_0 : i32, i32
  }
  func.func @transform_5(%arg0: i32) -> (i32, i32) {
    %c0_i32 = arith.constant 0 : i32
    %c0_i32_0 = arith.constant 0 : i32
    return %arg0, %c0_i32 : i32, i32
  }
}

</mosaic_0001>

<bundles_post_ra>
// kernel: tpu_custom_call.1
= control target key start
LH: loop header
LB: loop body
LE: loop exit
PB: predicated region body
PF: predicated region fallthrough
CT: control target
= control target key end

     0   :  { %v279_v2 = vmov 0.0|0.0   ;;  %vm280_vm0 = vmmov 0   ;;  %v281_v4 = vmov 0.0   ;;  %s352_s0 = inlined_call_operand.vmem [shape: f32[8,16], index: 0, kind: input, shape index: {}]   ;;  %s353_s1 = inlined_call_operand.vmem [shape: f32[16,32], index: 1, kind: input, shape index: {}]   ;;  %s354_s2 = inlined_call_operand.vmem [shape: f32[1,32], index: 2, kind: input, shape index: {}]   ;;  %s355_s3 = inlined_call_operand.vmem [shape: f32[32,8], index: 3, kind: input, shape index: {}]   ;;  %s356_s4 = inlined_call_operand.vmem [shape: f32[1,8], index: 4, kind: input, shape index: {}]   ;;  %s357_s5 = inlined_call_operand.hbm [shape: f32[8,8], index: 5, kind: output, shape index: {}]  }
   0x1   :  { %v22_v0 = vld [vmem:[%s353_s1] sm:$0xff]  ;;  %v23_v1 = vld [vmem:[%s353_s1 + $0x8] sm:$0xff]  ;;  %242 = vmatprep.subr.bf16.mxu0 %v279_v2  ;;  %228 = vmatprep.mubr.msk.f32.mxu0 %vm280_vm0, %v281_v4 }
   0x2   :  { %v243_v3 = vpack.c.bf16 %v23_v1, %v22_v0  ;;  %v108_v5 = vld [vmem:[%s355_s3] sm:$0xff]  ;;  %v109_v6 = vld [vmem:[%s355_s3 + $0x8] sm:$0xff]  ;;  %245 = vmatprep.subr.bf16.mxu1 %v279_v2  ;;  %239 = vmatprep.mubr.msk.f32.mxu1 %vm280_vm0, %v281_v4 }
   0x3   :  { %v246_v7 = vpack.c.bf16 %v109_v6, %v108_v5 }
   0x4   :  { %10 = vsyncpa [#allocation3], 0  ;;  %244 = vmatpush3.bf16.msra.mxu0 %v243_v3  ;;  %v21_v8 = vld [vmem:[%s352_s0] sm:$0xff]  ;;  %vm31_vm1 = vcmask 130048   ;;  %v110_v9 = vld [vmem:[%s355_s3 + $0x10] sm:$0xff]  ;;  %vm119_vm3 = vcmask 261120  }
   0x5   :  { %247 = vmatpush3.bf16.msra.mxu1 %v246_v7  ;;  %v111_v10 = vld [vmem:[%s355_s3 + $0x18] sm:$0xff]  ;;  %v212_v12 = vld [vmem:[%s354_s2] ss:$0 sm:$0xff]  ;;  %s282_s3 = smov [#allocation2]   ;;  %vm196_vm5 = vcmask 64512  }
   0x6   :  { %248 = vmatprep.subr.bf16.mxu1 %v279_v2  ;;  %v249_v11 = vpack.c.bf16 %v111_v10, %v110_v9  ;;  %v214_v18 = vld [vmem:[%s356_s4] ss:$0 sm:$0xff]  ;;  %s204_s9 = sshll.u32 %s282_s3, 4  ;;  %s205_s9 = int_to_ptr.vmem [resolvable:$true] %s204_s9 }
   0x7   :  { %229 = vmatmul.mubr.msk.f32.vlgmr.msra.gmra.mrb[0].mxu0 %vm31_vm1, %v21_v8  ;;  %s255_s2 = scalar_lea.vmem %s205_s9, 128  ;;  %p260_p1 = scmp.lt.s32.totalorder %s205_s9, %s205_s9 }
   0x8   :  { %p256_p0 = scmp.ne.s32.totalorder %s205_s9, %s255_s2  ;;  %p261_p2 = scmp.lt.s32.totalorder %s255_s2, %s255_s2 }
   0x9   :  { %250 = vmatpush3.bf16.msra.mxu1 %v249_v11 }
   0xa   :  { %p262_p3 = por %p261_p2, %p260_p1 }
   0xc   :  { %p263_p4 = pnand %p262_p3, %p256_p0 }
  0xda   :  { %v101_v13 = vpop.f32.mrb[0].mxu0 }
  0xdb   :  { %v102_v14 = vadd.f32 %v212_v12, %v101_v13  ;;  %v230_v15 = vpop.f32.mrb[1].mxu0 }
  0xdd   :  { %vm105_vm2 = vcmp.ge.f32.partialorder %v102_v14, 0.0  ;;  %v106_v16 = vmul.f32 0.01, %v102_v14 }
  0xdf   :  { %v107_v17 = vsel %vm105_vm2, %v102_v14, %v106_v16 }
  0xe0   :  { %240 = vmatmul.mubr.msk.f32.vlgmr.msra.gmra.mrb[0].mxu1 %vm119_vm3, %v107_v17 }
 0x1b3   :  { %v189_v19 = vpop.f32.mrb[0].mxu1 }
 0x1b4   :  { %v190_v20 = vadd.f32 %v214_v18, %v189_v19  ;;  %v241_v21 = vpop.f32.mrb[1].mxu1 }
 0x1b6   :  { %v194_v22 = vmul.f32 0.01, %v190_v20  ;;  %vm193_vm4 = vcmp.ge.f32.partialorder %v190_v20, 0.0 }
 0x1b8   :  { %v195_v23 = vsel %vm193_vm4, %v190_v20, %v194_v22 }
 0x1b9   :  { %197 = vst.msk [vmem:[#allocation2] sm:$0xff] %vm196_vm5, %v195_v23 }
 0x1ba   :  { %266 = shalt.err (!%p263_p4)
}
 0x1bb   :  { %s267_s11 = scalar_lea.hbm %s357_s5, 128 }
 0x1bc   :  { %p268_p5 = scmp.ne.s32.totalorder %s357_s5, %s267_s11  ;;  %p271_p6 = scmp.lt.u32.totalorder %s267_s11, %s357_s5 }
 0x1be   :  { %p273_p7 = pnand %p271_p6, %p268_p5 }
 0x1c0   :  { %276 = shalt.err (!%p273_p7)
}
 0x1c1   :  { %207 = dma.vmem_to_hbm [thread:$0]  %s205_s9, 128, %s357_s5, [#allocation3]  }
 0x1c2   :  { %277 = dma.done.wait [#allocation3], 128  }
 0x1c3   :  { %278 = vsyncadd [#allocation3], 4294967168 }
 0x1c4   :  { %211 = vsyncpa [#allocation3], 1 }

// kernel: tpu_custom_call.1
= control target key start
LH: loop header
LB: loop body
LE: loop exit
PB: predicated region body
PF: predicated region fallthrough
CT: control target
= control target key end

     0   :  { %v279_v2 = vmov 0.0|0.0   ;;  %vm280_vm0 = vmmov 0   ;;  %v281_v4 = vmov 0.0   ;;  %s352_s0 = inlined_call_operand.vmem [shape: f32[8,16], index: 0, kind: input, shape index: {}]   ;;  %s353_s1 = inlined_call_operand.vmem [shape: f32[16,32], index: 1, kind: input, shape index: {}]   ;;  %s354_s2 = inlined_call_operand.vmem [shape: f32[1,32], index: 2, kind: input, shape index: {}]   ;;  %s355_s3 = inlined_call_operand.vmem [shape: f32[32,8], index: 3, kind: input, shape index: {}]   ;;  %s356_s4 = inlined_call_operand.vmem [shape: f32[1,8], index: 4, kind: input, shape index: {}]   ;;  %s357_s5 = inlined_call_operand.hbm [shape: f32[8,8], index: 5, kind: output, shape index: {}]  }
   0x1   :  { %v22_v0 = vld [vmem:[%s353_s1] sm:$0xff]  ;;  %v23_v1 = vld [vmem:[%s353_s1 + $0x8] sm:$0xff]  ;;  %242 = vmatprep.subr.bf16.mxu0 %v279_v2  ;;  %228 = vmatprep.mubr.msk.f32.mxu0 %vm280_vm0, %v281_v4 }
   0x2   :  { %v243_v3 = vpack.c.bf16 %v23_v1, %v22_v0  ;;  %v108_v5 = vld [vmem:[%s355_s3] sm:$0xff]  ;;  %v109_v6 = vld [vmem:[%s355_s3 + $0x8] sm:$0xff]  ;;  %245 = vmatprep.subr.bf16.mxu1 %v279_v2  ;;  %239 = vmatprep.mubr.msk.f32.mxu1 %vm280_vm0, %v281_v4 }
   0x3   :  { %v246_v7 = vpack.c.bf16 %v109_v6, %v108_v5 }
   0x4   :  { %10 = vsyncpa [#allocation3], 0  ;;  %244 = vmatpush3.bf16.msra.mxu0 %v243_v3  ;;  %v21_v8 = vld [vmem:[%s352_s0] sm:$0xff]  ;;  %vm31_vm1 = vcmask 130048   ;;  %v110_v9 = vld [vmem:[%s355_s3 + $0x10] sm:$0xff]  ;;  %vm119_vm3 = vcmask 261120  }
   0x5   :  { %247 = vmatpush3.bf16.msra.mxu1 %v246_v7  ;;  %v111_v10 = vld [vmem:[%s355_s3 + $0x18] sm:$0xff]  ;;  %v212_v12 = vld [vmem:[%s354_s2] ss:$0 sm:$0xff]  ;;  %s282_s3 = smov [#allocation2]   ;;  %vm196_vm5 = vcmask 64512  }
   0x6   :  { %248 = vmatprep.subr.bf16.mxu1 %v279_v2  ;;  %v249_v11 = vpack.c.bf16 %v111_v10, %v110_v9  ;;  %v214_v18 = vld [vmem:[%s356_s4] ss:$0 sm:$0xff]  ;;  %s204_s9 = sshll.u32 %s282_s3, 4  ;;  %s205_s9 = int_to_ptr.vmem [resolvable:$true] %s204_s9 }
   0x7   :  { %229 = vmatmul.mubr.msk.f32.vlgmr.msra.gmra.mrb[0].mxu0 %vm31_vm1, %v21_v8  ;;  %s255_s2 = scalar_lea.vmem %s205_s9, 128  ;;  %p260_p1 = scmp.lt.s32.totalorder %s205_s9, %s205_s9 }
   0x8   :  { %p256_p0 = scmp.ne.s32.totalorder %s205_s9, %s255_s2  ;;  %p261_p2 = scmp.lt.s32.totalorder %s255_s2, %s255_s2 }
   0x9   :  { %250 = vmatpush3.bf16.msra.mxu1 %v249_v11 }
   0xa   :  { %p262_p3 = por %p261_p2, %p260_p1 }
   0xc   :  { %p263_p4 = pnand %p262_p3, %p256_p0 }
  0xda   :  { %v101_v13 = vpop.f32.mrb[0].mxu0 }
  0xdb   :  { %v102_v14 = vadd.f32 %v212_v12, %v101_v13  ;;  %v230_v15 = vpop.f32.mrb[1].mxu0 }
  0xdd   :  { %vm105_vm2 = vcmp.ge.f32.partialorder %v102_v14, 0.0  ;;  %v106_v16 = vmul.f32 0.01, %v102_v14 }
  0xdf   :  { %v107_v17 = vsel %vm105_vm2, %v102_v14, %v106_v16 }
  0xe0   :  { %240 = vmatmul.mubr.msk.f32.vlgmr.msra.gmra.mrb[0].mxu1 %vm119_vm3, %v107_v17 }
 0x1b3   :  { %v189_v19 = vpop.f32.mrb[0].mxu1 }
 0x1b4   :  { %v190_v20 = vadd.f32 %v214_v18, %v189_v19  ;;  %v241_v21 = vpop.f32.mrb[1].mxu1 }
 0x1b6   :  { %v194_v22 = vmul.f32 0.01, %v190_v20  ;;  %vm193_vm4 = vcmp.ge.f32.partialorder %v190_v20, 0.0 }
 0x1b8   :  { %v195_v23 = vsel %vm193_vm4, %v190_v20, %v194_v22 }
 0x1b9   :  { %197 = vst.msk [vmem:[#allocation2] sm:$0xff] %vm196_vm5, %v195_v23 }
 0x1ba   :  { %266 = shalt.err (!%p263_p4)
}
 0x1bb   :  { %s267_s11 = scalar_lea.hbm %s357_s5, 128 }
 0x1bc   :  { %p268_p5 = scmp.ne.s32.totalorder %s357_s5, %s267_s11  ;;  %p271_p6 = scmp.lt.u32.totalorder %s267_s11, %s357_s5 }
 0x1be   :  { %p273_p7 = pnand %p271_p6, %p268_p5 }
 0x1c0   :  { %276 = shalt.err (!%p273_p7)
}
 0x1c1   :  { %207 = dma.vmem_to_hbm [thread:$0]  %s205_s9, 128, %s357_s5, [#allocation3]  }
 0x1c2   :  { %277 = dma.done.wait [#allocation3], 128  }
 0x1c3   :  { %278 = vsyncadd [#allocation3], 4294967168 }
 0x1c4   :  { %211 = vsyncpa [#allocation3], 1 }

</bundles_post_ra>
